<compile_context>
chip_gen: v6e
topology: v6e:2x2x1
jax: 0.10.0
libtpu: 0.0.40
codegen_flags: <defaults>
</compile_context>

<pallas_src>
import jax
import jax.numpy as jnp
from jax.experimental import pallas as pl
from jax.experimental.pallas import tpu as pltpu


_MAX_COLS = 4096                 # lane-dense slab width (multiple of 128)
_CHUNK_BYTES = 1 * 1024 * 1024   # per-DMA chunk (HBM->HBM, no VMEM staging)
_MAX_INFLIGHT = 3                # DMAs in flight per grid step


def _squeezed_shape(in_shape, dim):
    """torch.Tensor.squeeze semantics (supports int, tuple of ints, or None)."""
    ndim = len(in_shape)
    if dim is None:
        axes = {i for i, s in enumerate(in_shape) if s == 1}
    else:
        dims = dim if isinstance(dim, (tuple, list)) else (dim,)
        axes = set()
        for d in dims:
            d = d if d >= 0 else d + ndim
            if in_shape[d] == 1:      # non-size-1 dim => no-op for that dim
                axes.add(d)
    return tuple(s for i, s in enumerate(in_shape) if i not in axes)


def _pick_layout(total, itemsize):
    """Pick a lane-dense (rows, cols) flattening, grid split and DMA chunking.

    Returns (rows, cols, n_steps, band_rows, chunk_rows) or None if no
    lane-dense layout exists (caller falls back to the zero-copy reshape).
    Invariants: rows == n_steps * band_rows (no ragged tail band).
    """
    cols = 0
    c = 128
    cap = min(total, _MAX_COLS)
    while c <= cap:
        if total % c == 0:
            cols = c
        c += 128
    if cols == 0:
        return None
    rows = total // cols
    sublane = max(8, 32 // itemsize)          # 8 (f32) / 16 (bf16) / 32 (i8)

    # Grid steps: prefer an even count >= 2 on slabs > 1 MiB so both v7x
    # TensorCores contribute DMA bandwidth; each band must divide rows evenly.
    n_steps = 1
    if total * itemsize > (1 << 20):
        for cand in (4, 2):
            if rows % cand == 0 and (rows // cand) >= sublane:
                n_steps = cand
                break
    band_rows = rows // n_steps

    # Per-band DMA chunk rows (static), sublane-aligned when possible.
    row_bytes = cols * itemsize
    chunk_rows = max(1, _CHUNK_BYTES // row_bytes)
    chunk_rows = min(chunk_rows, band_rows)
    if chunk_rows >= sublane:
        chunk_rows = (chunk_rows // sublane) * sublane
    return rows, cols, n_steps, band_rows, chunk_rows


def _make_dma_copy_kernel(band_rows, chunk_rows):
    """HBM->HBM chunked-DMA copy of one row band per grid step."""
    n_chunks = -(-band_rows // chunk_rows)    # ceil

    def kernel(x_ref, o_ref, sems):
        band = pl.program_id(0)
        base = band * band_rows               # dynamic start, static sizes
        copies = []
        for c in range(n_chunks):             # static trace-time loop
            off = c * chunk_rows
            size = min(chunk_rows, band_rows - off)
            cp = pltpu.make_async_copy(
                x_ref.at[pl.ds(base + off, size), :],
                o_ref.at[pl.ds(base + off, size), :],
                sems.at[c % _MAX_INFLIGHT],
            )
            if c >= _MAX_INFLIGHT:            # keep <= _MAX_INFLIGHT in flight
                copies[c - _MAX_INFLIGHT].wait()
            cp.start()
            copies.append(cp)
        for cp in copies[max(0, n_chunks - _MAX_INFLIGHT):]:
            cp.wait()

    return kernel


def squeeze_pallas(x, dim=None, use_copy_kernel=False):
    """Pallas equivalent of torch.Tensor.squeeze(dim=dim).

    use_copy_kernel=False (default) is the recommended production path: a
    zero-copy metadata reshape.  use_copy_kernel=True materializes the result
    via a tiled, multi-TensorCore HBM->HBM DMA copy kernel (fusion stand-in).
    """
    out_shape = _squeezed_shape(x.shape, dim)

    if (not use_copy_kernel) or x.size == 0:
        return jnp.reshape(x, out_shape)

    itemsize = jnp.dtype(x.dtype).itemsize
    layout = _pick_layout(x.size, itemsize)
    if layout is None:
        # TODO(synk): element count not a multiple of 128 -> zero-copy fallback.
        return jnp.reshape(x, out_shape)
    rows, cols, n_steps, band_rows, chunk_rows = layout

    x2d = jnp.reshape(x, (rows, cols))        # metadata-only flatten
    kernel = _make_dma_copy_kernel(band_rows, chunk_rows)

    y2d = pl.pallas_call(
        kernel,
        out_shape=jax.ShapeDtypeStruct((rows, cols), x.dtype),
        grid=(n_steps,),
        in_specs=[pl.BlockSpec(memory_space=pl.ANY)],    # raw HBM ref
        out_specs=pl.BlockSpec(memory_space=pl.ANY),     # raw HBM ref
        scratch_shapes=[pltpu.SemaphoreType.DMA((_MAX_INFLIGHT,))],
        compiler_params=pltpu.CompilerParams(
            dimension_semantics=("parallel",)),           # split bands over TCs
        cost_estimate=pl.CostEstimate(
            flops=0, transcendentals=0,
            bytes_accessed=2 * x.size * itemsize),
    )(x2d)

    return jnp.reshape(y2d, out_shape)        # metadata-only unflatten


class Squeeze:
    """Mirror of the PyTorch nn.Module."""

    def __init__(self, dim=None, use_copy_kernel=True):
        self.dim = dim
        self.use_copy_kernel = use_copy_kernel

    def __call__(self, x):
        return squeeze_pallas(x, dim=self.dim,
                              use_copy_kernel=self.use_copy_kernel)


if __name__ == "__main__":
    key = jax.random.PRNGKey(0)
    # (N, 1, C, H, W): singleton axis at dim=1 (the axis Squeeze(dim=1) removes)
    x = jax.random.normal(key, (2, 1, 4, 16, 16), dtype=jnp.float32)

    # Case 1: Squeeze(dim=1) via the HBM->HBM DMA copy kernel.
    y1 = Squeeze(dim=1)(x)
    jax.block_until_ready(y1)
    ref1 = jnp.squeeze(x, axis=1)
    assert y1.shape == (2, 4, 16, 16), y1.shape
    assert jnp.array_equal(y1, ref1)

    # Case 2: Squeeze() (dim=None) — squeeze all size-1 dims.
    y2 = Squeeze(dim=None)(x)
    jax.block_until_ready(y2)
    ref2 = jnp.squeeze(x)
    assert y2.shape == ref2.shape, (y2.shape, ref2.shape)
    assert jnp.array_equal(y2, ref2)

    # Case 3: larger input so the kernel runs a real multi-band grid
    # (rows=1024, cols=4096 -> 4 parallel bands, 4 chunked DMAs per band,
    # exercising the <=3-in-flight pipelining).
    x3 = jax.random.normal(jax.random.PRNGKey(1), (2, 1, 2048, 1024),
                           dtype=jnp.float32)
    y3 = squeeze_pallas(x3, dim=1, use_copy_kernel=True)
    jax.block_until_ready(y3)
    assert y3.shape == (2, 2048, 1024), y3.shape
    assert jnp.array_equal(y3, jnp.squeeze(x3, axis=1))

    # Case 4: squeeze on a non-size-1 dim is a no-op (torch semantics).
    y4 = squeeze_pallas(x, dim=0, use_copy_kernel=True)
    jax.block_until_ready(y4)
    assert y4.shape == x.shape and jnp.array_equal(y4, x)

    # Case 5: tuple of dims (modern torch API).
    y5 = squeeze_pallas(x, dim=(1,), use_copy_kernel=True)
    jax.block_until_ready(y5)
    assert jnp.array_equal(y5, ref1)

    # Case 6: preferred zero-copy metadata path (no kernel launch at all).
    y6 = squeeze_pallas(x, dim=1, use_copy_kernel=False)
    jax.block_until_ready(y6)
    assert jnp.array_equal(y6, ref1)

    print("KERNEL_OK")
</pallas_src>

<mosaic_0001>
module attributes {stable_mosaic.version = 11 : i64} {
  func.func @kernel(%arg0: i32, %arg1: memref<1x2048xf32, #tpu.memory_space<any>>, %arg2: memref<1x2048xf32, #tpu.memory_space<any>>, %arg3: memref<3x!tpu.dma_semaphore, #tpu.memory_space<semaphore_mem>>) attributes {dimension_semantics = [#tpu.dimension_semantics<parallel>], iteration_bounds = array<i64: 1>, scalar_prefetch = 0 : i64, scratch_operands = 1 : i64, tpu.core_type = #tpu.core_type<tc>, window_params = [{}, {}]} {
    %c1_i32 = arith.constant 1 : i32
    %0 = arith.muli %arg0, %c1_i32 : i32
    %c0_i32 = arith.constant 0 : i32
    %1 = arith.addi %0, %c0_i32 : i32
    %c0_i32_0 = arith.constant 0 : i32
    %2 = arith.addi %0, %c0_i32_0 : i32
    %c0_i32_1 = arith.constant 0 : i32
    %c0_i32_2 = arith.constant 0 : i32
    %3 = tpu.memref_slice %arg1[%1, %c0_i32_2] : memref<1x2048xf32, #tpu.memory_space<any>> -> memref<1x2048xf32, #tpu.memory_space<any>>
    %c0_i32_3 = arith.constant 0 : i32
    %4 = tpu.memref_slice %arg2[%2, %c0_i32_3] : memref<1x2048xf32, #tpu.memory_space<any>> -> memref<1x2048xf32, #tpu.memory_space<any>>
    %5 = tpu.memref_slice %arg3[%c0_i32_1] : memref<3x!tpu.dma_semaphore, #tpu.memory_space<semaphore_mem>> -> memref<1x!tpu.dma_semaphore, #tpu.memory_space<semaphore_mem>>
    %6 = tpu.memref_squeeze %5 : memref<1x!tpu.dma_semaphore, #tpu.memory_space<semaphore_mem>> -> memref<!tpu.dma_semaphore, #tpu.memory_space<semaphore_mem>>
    tpu.enqueue_dma source(%3 : memref<1x2048xf32, #tpu.memory_space<any>>) target(%4 : memref<1x2048xf32, #tpu.memory_space<any>>) target_semaphore(%6 : memref<!tpu.dma_semaphore, #tpu.memory_space<semaphore_mem>>)
    %c0_i32_4 = arith.constant 0 : i32
    %c0_i32_5 = arith.constant 0 : i32
    %7 = tpu.memref_slice %arg1[%1, %c0_i32_5] : memref<1x2048xf32, #tpu.memory_space<any>> -> memref<1x2048xf32, #tpu.memory_space<any>>
    %c0_i32_6 = arith.constant 0 : i32
    %8 = tpu.memref_slice %arg2[%2, %c0_i32_6] : memref<1x2048xf32, #tpu.memory_space<any>> -> memref<1x2048xf32, #tpu.memory_space<any>>
    %9 = tpu.memref_slice %arg3[%c0_i32_4] : memref<3x!tpu.dma_semaphore, #tpu.memory_space<semaphore_mem>> -> memref<1x!tpu.dma_semaphore, #tpu.memory_space<semaphore_mem>>
    %10 = tpu.memref_squeeze %9 : memref<1x!tpu.dma_semaphore, #tpu.memory_space<semaphore_mem>> -> memref<!tpu.dma_semaphore, #tpu.memory_space<semaphore_mem>>
    tpu.wait_dma2 semaphore(%10 : memref<!tpu.dma_semaphore, #tpu.memory_space<semaphore_mem>>) src(%7 : memref<1x2048xf32, #tpu.memory_space<any>>) dst(%8 : memref<1x2048xf32, #tpu.memory_space<any>>)
    return
  }
}

</mosaic_0001>

<bundles_post_ra>
// kernel: tpu_custom_call.1
= control target key start
LH: loop header
LB: loop body
LE: loop exit
PB: predicated region body
PF: predicated region fallthrough
CT: control target
= control target key end

     0   :  { %s49_s6 = smov [#allocation2]   ;;  %s50_s7 = smov 131072   ;;  %s68_s0 = inlined_call_operand.hbm [shape: f32[1,2048], index: 0, kind: input, shape index: {}]   ;;  %s69_s1 = inlined_call_operand.hbm [shape: f32[1,2048], index: 1, kind: output, shape index: {}]  }
   0x1   :  { %s51_s8 = smov 0  }
   0x2   :  { %17 = dma.general %s68_s0, 256, %s69_s1, %s49_s6, %s50_s7, [#allocation4], %s51_s8, 0  }
   0x3   :  { %47 = dma.done.wait [#allocation2], 256 }
   0x4   :  { %48 = vsyncadd [#allocation2], 4294967040 }
   0x5   :  { %21 = vsyncmov [#allocation2] }
   0x8   :  { %s22_s13 = vpop.sfrf %21 }
   0x9   :  { %p41_p0 = scmp.ne.s32.totalorder %s22_s13, 0 }
   0xb   :  { %26 = shalt.err (%p41_p0)  }
   0xc   :  { %28 = vsyncmov [#allocation2 + $0x1] }
   0xf   :  { %s29_s14 = vpop.sfrf %28 }
  0x10   :  { %p42_p1 = scmp.ne.s32.totalorder %s29_s14, 0 }
  0x12   :  { %33 = shalt.err (%p42_p1)  }
  0x13   :  { %35 = vsyncmov [#allocation2 + $0x2] }
  0x16   :  { %s36_s15 = vpop.sfrf %35 }
  0x17   :  { %p43_p2 = scmp.ne.s32.totalorder %s36_s15, 0 }
  0x19   :  { %40 = shalt.err (%p43_p2)  }

</bundles_post_ra>
